<compile_context>
chip_gen: v7x
topology: tpu7x:2x2x1
jax: 0.10.0
libtpu: 0.0.40
codegen_flags: <defaults>
</compile_context>

<pallas_src>
import jax
import jax.numpy as jnp
from jax.experimental import pallas as pl
from jax.experimental.pallas import tpu as pltpu

LANE = 128  # TPU vreg lane width


def _round_up(x, m):
    return ((x + m - 1) // m) * m


def _critic_adv_kernel(x_ref, w1_ref, b1_ref, w2_ref, b2_ref,
                       w3_ref, b3_ref, w4_ref, b4_ref, o_ref):
    """Fused MLP forward on one batch tile: 4 matmuls + activations.

    Matmul operands are bf16 (MXU-native on v6e/v7x); accumulation and all
    activation math are f32.
    """
    x = x_ref[...]                                   # (TB, S_pad) bf16

    # Layer 1: Linear + ReLU
    h1 = jnp.dot(x, w1_ref[...], preferred_element_type=jnp.float32) + b1_ref[...]
    h1 = jnp.maximum(h1, 0.0)

    # Layer 2: Linear + ReLU
    h2 = jnp.dot(h1.astype(jnp.bfloat16), w2_ref[...],
                 preferred_element_type=jnp.float32) + b2_ref[...]
    h2 = jnp.maximum(h2, 0.0)

    # Layer 3: Linear + Hardswish  (x * clamp(x + 3, 0, 6) / 6)
    h3 = jnp.dot(h2.astype(jnp.bfloat16), w3_ref[...],
                 preferred_element_type=jnp.float32) + b3_ref[...]
    h3 = h3 * jnp.clip(h3 + 3.0, 0.0, 6.0) * (1.0 / 6.0)

    # Layer 4: Linear to a lane-dense (TB, 128) slab (only column 0 is real;
    # padded weight columns are zero).
    out = jnp.dot(h3.astype(jnp.bfloat16), w4_ref[...],
                  preferred_element_type=jnp.float32) + b4_ref[...]
    o_ref[...] = out                                 # (TB, 128) f32, unmasked store


def _pad2(a, rows, cols):
    r, c = a.shape
    return jnp.pad(a, ((0, rows - r), (0, cols - c)))


def prepare_params(params):
    """Zero-pad feature dims to the 128-lane width and cast weights to bf16.

    Zero padding is exact: padded input features contribute 0, padded hidden
    units stay 0 through ReLU/Hardswish, and padded w4 rows/columns are 0, so
    column 0 of the output slab equals the unpadded result.
    """
    w1, b1, w2, b2, w3, b3, w4, b4 = params
    s, m = w1.shape
    sp = _round_up(s, LANE)
    mp = _round_up(m, LANE)

    w1p = _pad2(w1, sp, mp).astype(jnp.bfloat16)
    w2p = _pad2(w2, mp, mp).astype(jnp.bfloat16)
    w3p = _pad2(w3, mp, mp).astype(jnp.bfloat16)
    w4p = _pad2(w4, mp, LANE).astype(jnp.bfloat16)   # lane-dense final layer

    b1p = _pad2(b1.reshape(1, -1), 1, mp).astype(jnp.float32)
    b2p = _pad2(b2.reshape(1, -1), 1, mp).astype(jnp.float32)
    b3p = _pad2(b3.reshape(1, -1), 1, mp).astype(jnp.float32)
    b4p = _pad2(b4.reshape(1, -1), 1, LANE).astype(jnp.float32)

    return (w1p, b1p, w2p, b2p, w3p, b3p, w4p, b4p)


def critic_adv_forward(state, padded_params, tb=256):
    """state: (B, state_dim) f32 -> value: (B, 1) f32."""
    w1, b1, w2, b2, w3, b3, w4, b4 = padded_params
    B, S = state.shape
    Sp = w1.shape[0]

    # Batch tile: >=256 rows when the batch allows it; otherwise pad the batch
    # up to a sublane-aligned single tile.  TB always divides the padded batch.
    TB = min(tb, _round_up(B, 8))
    Bp = _round_up(B, TB)

    # Stream the state in bf16 (halves HBM traffic for the only per-step input).
    xp = jnp.pad(state.astype(jnp.bfloat16), ((0, Bp - B), (0, Sp - S)))

    const = lambda shape: pl.BlockSpec(shape, lambda i: (0, 0))

    out = pl.pallas_call(
        _critic_adv_kernel,
        out_shape=jax.ShapeDtypeStruct((Bp, LANE), jnp.float32),
        grid=(Bp // TB,),
        in_specs=[
            pl.BlockSpec((TB, Sp), lambda i: (i, 0)),   # batch-tiled state stream
            const(w1.shape), const(b1.shape),           # weights/biases: VMEM-resident
            const(w2.shape), const(b2.shape),
            const(w3.shape), const(b3.shape),
            const(w4.shape), const(b4.shape),
        ],
        out_specs=pl.BlockSpec((TB, LANE), lambda i: (i, 0)),
        compiler_params=pltpu.CompilerParams(
            # Batch axis is independent -> shard across v7x's 2 TensorCores.
            dimension_semantics=("parallel",),
        ),
    )(xp, w1, b1, w2, b2, w3, b3, w4, b4)

    return out[:B, :1]


def init_params(key, state_dim, mid_dim):
    """Deterministic synthetic parameters (shapes mirror the PyTorch module).

    Weights stored as (in_features, out_features); biases as (1, out_features).
    """
    ks = jax.random.split(key, 8)

    def lin(kw, kb, fan_in, fan_out):
        bound = 1.0 / jnp.sqrt(fan_in)
        w = jax.random.uniform(kw, (fan_in, fan_out), jnp.float32, -bound, bound)
        b = jax.random.uniform(kb, (1, fan_out), jnp.float32, -bound, bound)
        return w, b

    w1, b1 = lin(ks[0], ks[1], state_dim, mid_dim)
    w2, b2 = lin(ks[2], ks[3], mid_dim, mid_dim)
    w3, b3 = lin(ks[4], ks[5], mid_dim, mid_dim)
    w4, b4 = lin(ks[6], ks[7], mid_dim, 1)
    return (w1, b1, w2, b2, w3, b3, w4, b4)


def reference_forward_bf16(state, params):
    """Pure-JAX reference that mirrors the kernel's bf16-operand matmuls."""
    w1, b1, w2, b2, w3, b3, w4, b4 = params
    bf = jnp.bfloat16
    h = jnp.dot(state.astype(bf), w1.astype(bf),
                preferred_element_type=jnp.float32) + b1
    h = jnp.maximum(h, 0.0)
    h = jnp.dot(h.astype(bf), w2.astype(bf),
                preferred_element_type=jnp.float32) + b2
    h = jnp.maximum(h, 0.0)
    h = jnp.dot(h.astype(bf), w3.astype(bf),
                preferred_element_type=jnp.float32) + b3
    h = h * jnp.clip(h + 3.0, 0.0, 6.0) / 6.0
    return jnp.dot(h.astype(bf), w4.astype(bf),
                   preferred_element_type=jnp.float32) + b4


if __name__ == "__main__":
    key = jax.random.PRNGKey(0)
    k_params, k_state = jax.random.split(key)

    batch = 8
    state_dim = 16
    mid_dim = 32

    params = init_params(k_params, state_dim, mid_dim)
    state = jax.random.normal(k_state, (batch, state_dim), jnp.float32)

    padded_params = prepare_params(params)
    out = critic_adv_forward(state, padded_params)
    out = jax.block_until_ready(out)

    ref = reference_forward_bf16(state, params)
    assert out.shape == (batch, 1), out.shape
    assert jnp.allclose(out, ref, atol=1e-2, rtol=1e-2), (
        f"max abs err = {jnp.max(jnp.abs(out - ref))}")

    print("KERNEL_OK")
</pallas_src>

<mosaic_0001>
module attributes {stable_mosaic.version = 11 : i64} {
  func.func @_critic_adv_kernel(%arg0: i32, %arg1: memref<8x128xbf16, #tpu.memory_space<vmem>>, %arg2: memref<128x128xbf16, #tpu.memory_space<vmem>>, %arg3: memref<1x128xf32, #tpu.memory_space<vmem>>, %arg4: memref<128x128xbf16, #tpu.memory_space<vmem>>, %arg5: memref<1x128xf32, #tpu.memory_space<vmem>>, %arg6: memref<128x128xbf16, #tpu.memory_space<vmem>>, %arg7: memref<1x128xf32, #tpu.memory_space<vmem>>, %arg8: memref<128x128xbf16, #tpu.memory_space<vmem>>, %arg9: memref<1x128xf32, #tpu.memory_space<vmem>>, %arg10: memref<8x128xf32, #tpu.memory_space<vmem>>) attributes {dimension_semantics = [#tpu.dimension_semantics<parallel>], iteration_bounds = array<i64: 1>, scalar_prefetch = 0 : i64, scratch_operands = 0 : i64, tpu.core_type = #tpu.core_type<tc>, window_params = [{transform_indices = @transform_0, window_bounds = array<i64: 8, 128>}, {pipeline_mode = #tpu.pipeline_mode<synchronous>, transform_indices = @transform_1, window_bounds = array<i64: 128, 128>}, {pipeline_mode = #tpu.pipeline_mode<synchronous>, transform_indices = @transform_2, window_bounds = array<i64: 1, 128>}, {pipeline_mode = #tpu.pipeline_mode<synchronous>, transform_indices = @transform_3, window_bounds = array<i64: 128, 128>}, {pipeline_mode = #tpu.pipeline_mode<synchronous>, transform_indices = @transform_4, window_bounds = array<i64: 1, 128>}, {pipeline_mode = #tpu.pipeline_mode<synchronous>, transform_indices = @transform_5, window_bounds = array<i64: 128, 128>}, {pipeline_mode = #tpu.pipeline_mode<synchronous>, transform_indices = @transform_6, window_bounds = array<i64: 1, 128>}, {pipeline_mode = #tpu.pipeline_mode<synchronous>, transform_indices = @transform_7, window_bounds = array<i64: 128, 128>}, {pipeline_mode = #tpu.pipeline_mode<synchronous>, transform_indices = @transform_8, window_bounds = array<i64: 1, 128>}, {transform_indices = @transform_9, window_bounds = array<i64: 8, 128>}]} {
    %c0 = arith.constant 0 : index
    %c0_0 = arith.constant 0 : index
    %0 = vector.load %arg1[%c0, %c0_0] : memref<8x128xbf16, #tpu.memory_space<vmem>>, vector<8x128xbf16>
    %c0_1 = arith.constant 0 : index
    %c0_2 = arith.constant 0 : index
    %1 = vector.load %arg2[%c0_1, %c0_2] : memref<128x128xbf16, #tpu.memory_space<vmem>>, vector<128x128xbf16>
    %cst = arith.constant dense<0.000000e+00> : vector<8x128xf32>
    %2 = tpu.matmul %0, %1, %cst {dimension_numbers = #tpu.dot_dimension_numbers<[1], [0], [0], [1], [0, 0, 1, 1], [], []>} : vector<8x128xbf16>, vector<128x128xbf16>, vector<8x128xf32> -> vector<8x128xf32>
    %c0_3 = arith.constant 0 : index
    %c0_4 = arith.constant 0 : index
    %3 = vector.load %arg3[%c0_3, %c0_4] : memref<1x128xf32, #tpu.memory_space<vmem>>, vector<1x128xf32>
    %4 = vector.broadcast %3 : vector<1x128xf32> to vector<8x128xf32>
    %5 = arith.addf %2, %4 : vector<8x128xf32>
    %cst_5 = arith.constant 0.000000e+00 : f32
    %6 = vector.broadcast %cst_5 : f32 to vector<8x128xf32>
    %7 = arith.maximumf %5, %6 : vector<8x128xf32>
    %8 = arith.truncf %7 : vector<8x128xf32> to vector<8x128xbf16>
    %c0_6 = arith.constant 0 : index
    %c0_7 = arith.constant 0 : index
    %9 = vector.load %arg4[%c0_6, %c0_7] : memref<128x128xbf16, #tpu.memory_space<vmem>>, vector<128x128xbf16>
    %cst_8 = arith.constant dense<0.000000e+00> : vector<8x128xf32>
    %10 = tpu.matmul %8, %9, %cst_8 {dimension_numbers = #tpu.dot_dimension_numbers<[1], [0], [0], [1], [0, 0, 1, 1], [], []>} : vector<8x128xbf16>, vector<128x128xbf16>, vector<8x128xf32> -> vector<8x128xf32>
    %c0_9 = arith.constant 0 : index
    %c0_10 = arith.constant 0 : index
    %11 = vector.load %arg5[%c0_9, %c0_10] : memref<1x128xf32, #tpu.memory_space<vmem>>, vector<1x128xf32>
    %12 = vector.broadcast %11 : vector<1x128xf32> to vector<8x128xf32>
    %13 = arith.addf %10, %12 : vector<8x128xf32>
    %cst_11 = arith.constant 0.000000e+00 : f32
    %14 = vector.broadcast %cst_11 : f32 to vector<8x128xf32>
    %15 = arith.maximumf %13, %14 : vector<8x128xf32>
    %16 = arith.truncf %15 : vector<8x128xf32> to vector<8x128xbf16>
    %c0_12 = arith.constant 0 : index
    %c0_13 = arith.constant 0 : index
    %17 = vector.load %arg6[%c0_12, %c0_13] : memref<128x128xbf16, #tpu.memory_space<vmem>>, vector<128x128xbf16>
    %cst_14 = arith.constant dense<0.000000e+00> : vector<8x128xf32>
    %18 = tpu.matmul %16, %17, %cst_14 {dimension_numbers = #tpu.dot_dimension_numbers<[1], [0], [0], [1], [0, 0, 1, 1], [], []>} : vector<8x128xbf16>, vector<128x128xbf16>, vector<8x128xf32> -> vector<8x128xf32>
    %c0_15 = arith.constant 0 : index
    %c0_16 = arith.constant 0 : index
    %19 = vector.load %arg7[%c0_15, %c0_16] : memref<1x128xf32, #tpu.memory_space<vmem>>, vector<1x128xf32>
    %20 = vector.broadcast %19 : vector<1x128xf32> to vector<8x128xf32>
    %21 = arith.addf %18, %20 : vector<8x128xf32>
    %cst_17 = arith.constant 3.000000e+00 : f32
    %22 = vector.broadcast %cst_17 : f32 to vector<8x128xf32>
    %23 = arith.addf %21, %22 : vector<8x128xf32>
    %cst_18 = arith.constant 0.000000e+00 : f32
    %cst_19 = arith.constant 6.000000e+00 : f32
    %24 = vector.broadcast %cst_18 : f32 to vector<8x128xf32>
    %25 = arith.maximumf %24, %23 : vector<8x128xf32>
    %26 = vector.broadcast %cst_19 : f32 to vector<8x128xf32>
    %27 = arith.minimumf %26, %25 : vector<8x128xf32>
    %28 = arith.mulf %21, %27 : vector<8x128xf32>
    %cst_20 = arith.constant 0.166666672 : f32
    %29 = vector.broadcast %cst_20 : f32 to vector<8x128xf32>
    %30 = arith.mulf %28, %29 : vector<8x128xf32>
    %31 = arith.truncf %30 : vector<8x128xf32> to vector<8x128xbf16>
    %c0_21 = arith.constant 0 : index
    %c0_22 = arith.constant 0 : index
    %32 = vector.load %arg8[%c0_21, %c0_22] : memref<128x128xbf16, #tpu.memory_space<vmem>>, vector<128x128xbf16>
    %cst_23 = arith.constant dense<0.000000e+00> : vector<8x128xf32>
    %33 = tpu.matmul %31, %32, %cst_23 {dimension_numbers = #tpu.dot_dimension_numbers<[1], [0], [0], [1], [0, 0, 1, 1], [], []>} : vector<8x128xbf16>, vector<128x128xbf16>, vector<8x128xf32> -> vector<8x128xf32>
    %c0_24 = arith.constant 0 : index
    %c0_25 = arith.constant 0 : index
    %34 = vector.load %arg9[%c0_24, %c0_25] : memref<1x128xf32, #tpu.memory_space<vmem>>, vector<1x128xf32>
    %35 = vector.broadcast %34 : vector<1x128xf32> to vector<8x128xf32>
    %36 = arith.addf %33, %35 : vector<8x128xf32>
    %c0_26 = arith.constant 0 : index
    %c0_27 = arith.constant 0 : index
    %37 = vector.load %arg10[%c0_26, %c0_27] : memref<8x128xf32, #tpu.memory_space<vmem>>, vector<8x128xf32>
    tpu.vector_store %arg10[%c0_26, %c0_27], %36 {strides = array<i32>} : memref<8x128xf32, #tpu.memory_space<vmem>>, vector<8x128xf32>,
    return
  }
  func.func @transform_0(%arg0: i32) -> (i32, i32) {
    %c0_i32 = arith.constant 0 : i32
    %c0_i32_0 = arith.constant 0 : i32
    return %arg0, %c0_i32 : i32, i32
  }
  func.func @transform_1(%arg0: i32) -> (i32, i32) {
    %c0_i32 = arith.constant 0 : i32
    %c0_i32_0 = arith.constant 0 : i32
    %c0_i32_1 = arith.constant 0 : i32
    return %c0_i32, %c0_i32_0 : i32, i32
  }
  func.func @transform_2(%arg0: i32) -> (i32, i32) {
    %c0_i32 = arith.constant 0 : i32
    %c0_i32_0 = arith.constant 0 : i32
    %c0_i32_1 = arith.constant 0 : i32
    return %c0_i32, %c0_i32_0 : i32, i32
  }
  func.func @transform_3(%arg0: i32) -> (i32, i32) {
    %c0_i32 = arith.constant 0 : i32
    %c0_i32_0 = arith.constant 0 : i32
    %c0_i32_1 = arith.constant 0 : i32
    return %c0_i32, %c0_i32_0 : i32, i32
  }
  func.func @transform_4(%arg0: i32) -> (i32, i32) {
    %c0_i32 = arith.constant 0 : i32
    %c0_i32_0 = arith.constant 0 : i32
    %c0_i32_1 = arith.constant 0 : i32
    return %c0_i32, %c0_i32_0 : i32, i32
  }
  func.func @transform_5(%arg0: i32) -> (i32, i32) {
    %c0_i32 = arith.constant 0 : i32
    %c0_i32_0 = arith.constant 0 : i32
    %c0_i32_1 = arith.constant 0 : i32
    return %c0_i32, %c0_i32_0 : i32, i32
  }
  func.func @transform_6(%arg0: i32) -> (i32, i32) {
    %c0_i32 = arith.constant 0 : i32
    %c0_i32_0 = arith.constant 0 : i32
    %c0_i32_1 = arith.constant 0 : i32
    return %c0_i32, %c0_i32_0 : i32, i32
  }
  func.func @transform_7(%arg0: i32) -> (i32, i32) {
    %c0_i32 = arith.constant 0 : i32
    %c0_i32_0 = arith.constant 0 : i32
    %c0_i32_1 = arith.constant 0 : i32
    return %c0_i32, %c0_i32_0 : i32, i32
  }
  func.func @transform_8(%arg0: i32) -> (i32, i32) {
    %c0_i32 = arith.constant 0 : i32
    %c0_i32_0 = arith.constant 0 : i32
    %c0_i32_1 = arith.constant 0 : i32
    return %c0_i32, %c0_i32_0 : i32, i32
  }
  func.func @transform_9(%arg0: i32) -> (i32, i32) {
    %c0_i32 = arith.constant 0 : i32
    %c0_i32_0 = arith.constant 0 : i32
    return %arg0, %c0_i32 : i32, i32
  }
}

</mosaic_0001>

<bundles_post_ra>
// kernel: tpu_custom_call.1
= control target key start
LH: loop header
LB: loop body
LE: loop exit
PB: predicated region body
PF: predicated region fallthrough
CT: control target
= control target key end

     0   :  { %14 = vsyncpa [#allocation3], 0  ;;  %s1103_s0 = inlined_call_operand.hbm [shape: bf16[8,128], index: 0, kind: input, shape index: {}]   ;;  %s1104_s1 = inlined_call_operand.hbm [shape: bf16[128,128], index: 1, kind: input, shape index: {}]   ;;  %s1105_s2 = inlined_call_operand.vmem [shape: f32[1,128], index: 2, kind: input, shape index: {}]   ;;  %s1106_s3 = inlined_call_operand.hbm [shape: bf16[128,128], index: 3, kind: input, shape index: {}]   ;;  %s1107_s4 = inlined_call_operand.vmem [shape: f32[1,128], index: 4, kind: input, shape index: {}]   ;;  %s1108_s5 = inlined_call_operand.hbm [shape: bf16[128,128], index: 5, kind: input, shape index: {}]   ;;  %s1109_s6 = inlined_call_operand.vmem [shape: f32[1,128], index: 6, kind: input, shape index: {}]   ;;  %s1110_s7 = inlined_call_operand.hbm [shape: bf16[128,128], index: 7, kind: input, shape index: {}]   ;;  %s1111_s8 = inlined_call_operand.vmem [shape: f32[1,128], index: 8, kind: input, shape index: {}]   ;;  %s1112_s9 = inlined_call_operand.hbm [shape: f32[8,128], index: 9, kind: output, shape index: {}]  }
   0x1   :  { %15 = vsyncpa [#allocation6], 0 }
   0x2   :  { %16 = vsyncpa [#allocation9], 0 }
   0x3   :  { %17 = vsyncpa [#allocation4], 0  ;;  %s907_s30 = smov [#allocation5]   ;;  %s767_s13 = scalar_lea.hbm %s1104_s1, 1024 }
   0x4   :  { %s33_s10 = sshll.u32 %s907_s30, 4  ;;  %p768_p0 = scmp.ne.s32.totalorder %s1104_s1, %s767_s13  ;;  %s34_s10 = int_to_ptr.vmem [resolvable:$true] %s33_s10 }
   0x5   :  { %p771_p1 = scmp.lt.u32.totalorder %s767_s13, %s1104_s1 }
   0x7   :  { %p773_p2 = pnand %p771_p1, %p768_p0 }
   0x9   :  { %776 = shalt.err (!%p773_p2)
}
   0xa   :  { %s777_s18 = scalar_lea.vmem %s34_s10, 1024  ;;  %p782_p4 = scmp.lt.s32.totalorder %s34_s10, %s34_s10 }
   0xb   :  { %p778_p3 = scmp.ne.s32.totalorder %s34_s10, %s777_s18  ;;  %p783_p5 = scmp.lt.s32.totalorder %s777_s18, %s777_s18 }
   0xd   :  { %p784_p6 = por %p783_p5, %p782_p4 }
   0xf   :  { %p785_p7 = pnand %p784_p6, %p778_p3 }
  0x11   :  { %788 = shalt.err (!%p785_p7)
}
  0x12   :  { %s908_s19 = smov 64   ;;  %s909_s20 = smov 4  }
  0x13   :  { %39 = dma.hbm_to_vmem [thread:$0]  %s1104_s1, 1024, %s34_s10, [#allocation6], %s908_s19, %s908_s19, %s909_s20  }
  0x14   :  { %s910_s23 = smov [#allocation8]   ;;  %s911_s25 = smov [#allocation2]  }
  0x15   :  { %s61_s24 = sshll.u32 %s910_s23, 4  ;;  %s24_s26 = sshll.u32 %s911_s25, 4  ;;  %s62_s24 = int_to_ptr.vmem [resolvable:$true] %s61_s24  ;;  %s25_s26 = int_to_ptr.vmem [resolvable:$true] %s24_s26 }
  0x16   :  { %s789_s29 = scalar_lea.hbm %s1108_s5, 1024 }
  0x17   :  { %p790_p8 = scmp.ne.s32.totalorder %s1108_s5, %s789_s29  ;;  %p793_p9 = scmp.lt.u32.totalorder %s789_s29, %s1108_s5 }
  0x19   :  { %p795_p10 = pnand %p793_p9, %p790_p8 }
  0x1b   :  { %798 = shalt.err (!%p795_p10)
}
  0x1c   :  { %s799_s1 = scalar_lea.vmem %s62_s24, 1024  ;;  %p804_p12 = scmp.lt.s32.totalorder %s62_s24, %s62_s24 }
  0x1d   :  { %p800_p11 = scmp.ne.s32.totalorder %s62_s24, %s799_s1  ;;  %p805_p13 = scmp.lt.s32.totalorder %s799_s1, %s799_s1 }
  0x1f   :  { %p806_p0 = por %p805_p13, %p804_p12 }
  0x21   :  { %p807_p1 = pnand %p806_p0, %p800_p11 }
  0x23   :  { %810 = shalt.err (!%p807_p1)
}
  0x24   :  { %67 = dma.hbm_to_vmem [thread:$0]  %s1108_s5, 1024, %s62_s24, [#allocation9], %s908_s19, %s908_s19, %s909_s20  }
  0x25   :  { %s811_s17 = scalar_lea.hbm %s1103_s0, 64 }
  0x26   :  { %p812_p2 = scmp.ne.s32.totalorder %s1103_s0, %s811_s17  ;;  %p815_p3 = scmp.lt.u32.totalorder %s811_s17, %s1103_s0 }
  0x28   :  { %p817_p4 = pnand %p815_p3, %p812_p2 }
  0x2a   :  { %820 = shalt.err (!%p817_p4)
}
  0x2b   :  { %s821_s25 = scalar_lea.vmem %s25_s26, 64  ;;  %p826_p6 = scmp.lt.s32.totalorder %s25_s26, %s25_s26 }
  0x2c   :  { %p822_p5 = scmp.ne.s32.totalorder %s25_s26, %s821_s25  ;;  %p827_p7 = scmp.lt.s32.totalorder %s821_s25, %s821_s25 }
  0x2e   :  { %p828_p8 = por %p827_p7, %p826_p6 }
  0x30   :  { %p829_p9 = pnand %p828_p8, %p822_p5 }
  0x32   :  { %832 = shalt.err (!%p829_p9)
}
  0x33   :  { %27 = dma.hbm_to_vmem [thread:$0]  %s1103_s0, 64, %s25_s26, [#allocation3]  }
  0x34   :  { %s912_s27 = smov [#allocation7]   ;;  %s913_s29 = smov [#allocation10]  }
  0x35   :  { %s47_s28 = sshll.u32 %s912_s27, 4  ;;  %s75_s30 = sshll.u32 %s913_s29, 4  ;;  %s48_s28 = int_to_ptr.vmem [resolvable:$true] %s47_s28  ;;  %s76_s30 = int_to_ptr.vmem [resolvable:$true] %s75_s30 }
  0x36   :  { %s833_s13 = scalar_lea.hbm %s1106_s3, 1024 }
  0x37   :  { %p834_p10 = scmp.ne.s32.totalorder %s1106_s3, %s833_s13  ;;  %p837_p11 = scmp.lt.u32.totalorder %s833_s13, %s1106_s3 }
  0x39   :  { %p839_p12 = pnand %p837_p11, %p834_p10 }
  0x3b   :  { %842 = shalt.err (!%p839_p12)
}
  0x3c   :  { %s843_s0 = scalar_lea.vmem %s48_s28, 1024  ;;  %p848_p0 = scmp.lt.s32.totalorder %s48_s28, %s48_s28 }
  0x3d   :  { %p844_p13 = scmp.ne.s32.totalorder %s48_s28, %s843_s0  ;;  %p849_p1 = scmp.lt.s32.totalorder %s843_s0, %s843_s0 }
  0x3f   :  { %p850_p2 = por %p849_p1, %p848_p0 }
  0x41   :  { %p851_p3 = pnand %p850_p2, %p844_p13 }
  0x43   :  { %854 = shalt.err (!%p851_p3)
}
  0x44   :  { %53 = dma.hbm_to_vmem [thread:$0]  %s1106_s3, 1024, %s48_s28, [#allocation6], %s908_s19, %s908_s19, %s909_s20  }
  0x45   :  { %s855_s21 = scalar_lea.hbm %s1110_s7, 1024 }
  0x46   :  { %p856_p4 = scmp.ne.s32.totalorder %s1110_s7, %s855_s21  ;;  %p859_p5 = scmp.lt.u32.totalorder %s855_s21, %s1110_s7 }
  0x48   :  { %p861_p6 = pnand %p859_p5, %p856_p4 }
  0x4a   :  { %864 = shalt.err (!%p861_p6)
}
  0x4b   :  { %s865_s24 = scalar_lea.vmem %s76_s30, 1024  ;;  %p870_p8 = scmp.lt.s32.totalorder %s76_s30, %s76_s30 }
  0x4c   :  { %p866_p7 = scmp.ne.s32.totalorder %s76_s30, %s865_s24  ;;  %p871_p9 = scmp.lt.s32.totalorder %s865_s24, %s865_s24 }
  0x4e   :  { %p872_p10 = por %p871_p9, %p870_p8 }
  0x50   :  { %p873_p11 = pnand %p872_p10, %p866_p7 }
  0x52   :  { %876 = shalt.err (!%p873_p11)
}
  0x53   :  { %81 = dma.hbm_to_vmem [thread:$0]  %s1110_s7, 1024, %s76_s30, [#allocation9], %s908_s19, %s908_s19, %s909_s20  }
  0x54   :  { %899 = dma.done.wait [#allocation3], 64  }
  0x55   :  { %900 = vsyncadd [#allocation3], 4294967232 }
  0x56   :  { %901 = dma.done.wait [#allocation6], 2048  }
  0x57   :  { %902 = vsyncadd [#allocation6], 4294965248 }
  0x58   :  { %903 = dma.done.wait [#allocation9], 2048  }
  0x59   :  { %904 = vsyncadd [#allocation9], 4294965248  ;;  %v914_v0 = vmov 0.0   ;;  %vm915_vm0 = vmmov 0   ;;  %v735_v1 = vld [vmem:[#allocation5] sm:$0xff]   ;;  %v736_v2 = vld [vmem:[#allocation5 + $0x8] sm:$0xff]  }
  0x5a   :  { %645 = vmatprep.subr.bf16.mxu0 %v914_v0  ;;  %661 = vmatprep.mubr.msk.bf16.mxu0 %vm915_vm0, %v914_v0  ;;  %v737_v3 = vld [vmem:[#allocation5 + $0x10] sm:$0xff]   ;;  %v743_v4 = vld [vmem:[#allocation7] sm:$0xff]   ;;  %v738_v5 = vld [vmem:[#allocation5 + $0x18] sm:$0xff]   ;;  %s916_s11 = smov [#allocation11]  }
  0x5b   :  { %665 = vmatprep.subr.bf16.mxu1 %v914_v0  ;;  %681 = vmatprep.mubr.msk.bf16.mxu1 %vm915_vm0, %v914_v0  ;;  %v744_v6 = vld [vmem:[#allocation7 + $0x8] sm:$0xff]   ;;  %v739_v7 = vld [vmem:[#allocation5 + $0x20] sm:$0xff]   ;;  %v745_v8 = vld [vmem:[#allocation7 + $0x10] sm:$0xff]   ;;  %s562_s12 = sshll.u32 %s916_s11, 4  ;;  %s563_s12 = int_to_ptr.vmem [resolvable:$true] %s562_s12 }
  0x5c   :  { %646 = vmatpush3.bf16.msra.mxu0 %v735_v1  ;;  %666 = vmatpush3.bf16.msra.mxu1 %v743_v4  ;;  %v740_v9 = vld [vmem:[#allocation5 + $0x28] sm:$0xff]   ;;  %v746_v10 = vld [vmem:[#allocation7 + $0x18] sm:$0xff]   ;;  %v741_v11 = vld [vmem:[#allocation5 + $0x30] sm:$0xff]   ;;  %p882_p13 = scmp.lt.s32.totalorder %s563_s12, %s563_s12 }
  0x5d   :  { %647 = vmatprep.subr.bf16.mxu0 %v914_v0  ;;  %667 = vmatprep.subr.bf16.mxu1 %v914_v0  ;;  %v747_v12 = vld [vmem:[#allocation7 + $0x20] sm:$0xff]   ;;  %v742_v13 = vld [vmem:[#allocation5 + $0x38] sm:$0xff]   ;;  %v748_v14 = vld [vmem:[#allocation7 + $0x28] sm:$0xff]  }
  0x5e   :  { %v100_v15 = vld [vmem:[#allocation2] sm:$0xf]  ;;  %v749_v16 = vld [vmem:[#allocation7 + $0x30] sm:$0xff]   ;;  %v751_v18 = vld [vmem:[#allocation8] sm:$0xff]  }
  0x5f   :  { %v750_v17 = vld [vmem:[#allocation7 + $0x38] sm:$0xff]   ;;  %v752_v19 = vld [vmem:[#allocation8 + $0x8] sm:$0xff]   ;;  %v753_v20 = vld [vmem:[#allocation8 + $0x10] sm:$0xff]  }
  0x60   :  { %648 = vmatpush3.bf16.msra.mxu0 %v736_v2  ;;  %668 = vmatpush3.bf16.msra.mxu1 %v744_v6  ;;  %v754_v21 = vld [vmem:[#allocation8 + $0x18] sm:$0xff]   ;;  %v755_v22 = vld [vmem:[#allocation8 + $0x20] sm:$0xff]   ;;  %v756_v23 = vld [vmem:[#allocation8 + $0x28] sm:$0xff]  }
  0x61   :  { %649 = vmatprep.subr.bf16.mxu0 %v914_v0  ;;  %669 = vmatprep.subr.bf16.mxu1 %v914_v0  ;;  %v573_v24 = vld [vmem:[%s1105_s2] ss:$0 sm:$0xff]  ;;  %v757_v32 = vld [vmem:[#allocation8 + $0x30] sm:$0xff]   ;;  %v759_v34 = vld [vmem:[#allocation10] sm:$0xff]  }
  0x62   :  { %v758_v33 = vld [vmem:[#allocation8 + $0x38] sm:$0xff]   ;;  %v760_v35 = vld [vmem:[#allocation10 + $0x8] sm:$0xff]   ;;  %v761_v36 = vld [vmem:[#allocation10 + $0x10] sm:$0xff]  }
  0x63   :  { %v762_v37 = vld [vmem:[#allocation10 + $0x18] sm:$0xff]   ;;  %v763_v46 = vld [vmem:[#allocation10 + $0x20] sm:$0xff]   ;;  %v764_v47 = vld [vmem:[#allocation10 + $0x28] sm:$0xff]  }
  0x64   :  { %650 = vmatpush3.bf16.msra.mxu0 %v737_v3  ;;  %670 = vmatpush3.bf16.msra.mxu1 %v745_v8  ;;  %v582_v38 = vld [vmem:[%s1107_s4] ss:$0 sm:$0xff]  ;;  %v765_v48 = vld [vmem:[#allocation10 + $0x30] sm:$0xff]  }
  0x65   :  { %651 = vmatprep.subr.bf16.mxu0 %v914_v0  ;;  %671 = vmatprep.subr.bf16.mxu1 %v914_v0  ;;  %v766_v49 = vld [vmem:[#allocation10 + $0x38] sm:$0xff]  }
  0x66   :  { %v591_v50 = vld [vmem:[%s1109_s6] ss:$0 sm:$0xff]  ;;  %s877_s6 = scalar_lea.vmem %s563_s12, 128 }
  0x67   :  { %v600_v62 = vld [vmem:[%s1111_s8] ss:$0 sm:$0xff]  ;;  %p878_p12 = scmp.ne.s32.totalorder %s563_s12, %s877_s6  ;;  %p883_p0 = scmp.lt.s32.totalorder %s877_s6, %s877_s6 }
  0x68   :  { %652 = vmatpush3.bf16.msra.mxu0 %v738_v5  ;;  %672 = vmatpush3.bf16.msra.mxu1 %v746_v10 }
  0x69   :  { %653 = vmatprep.subr.bf16.mxu0 %v914_v0  ;;  %673 = vmatprep.subr.bf16.mxu1 %v914_v0  ;;  %p884_p1 = por %p883_p0, %p882_p13 }
  0x6b   :  { %p885_p2 = pnand %p884_p1, %p878_p12 }
  0x6c   :  { %654 = vmatpush3.bf16.msra.mxu0 %v739_v7  ;;  %674 = vmatpush3.bf16.msra.mxu1 %v747_v12 }
  0x6d   :  { %655 = vmatprep.subr.bf16.mxu0 %v914_v0  ;;  %675 = vmatprep.subr.bf16.mxu1 %v914_v0 }
  0x70   :  { %656 = vmatpush3.bf16.msra.mxu0 %v740_v9  ;;  %676 = vmatpush3.bf16.msra.mxu1 %v748_v14 }
  0x71   :  { %657 = vmatprep.subr.bf16.mxu0 %v914_v0  ;;  %677 = vmatprep.subr.bf16.mxu1 %v914_v0 }
  0x74   :  { %658 = vmatpush3.bf16.msra.mxu0 %v741_v11  ;;  %678 = vmatpush3.bf16.msra.mxu1 %v749_v16 }
  0x75   :  { %659 = vmatprep.subr.bf16.mxu0 %v914_v0  ;;  %679 = vmatprep.subr.bf16.mxu1 %v914_v0 }
  0x78   :  { %660 = vmatpush3.bf16.msra.mxu0 %v742_v13  ;;  %680 = vmatpush3.bf16.msra.mxu1 %v750_v17 }
  0x79   :  { %685 = vmatprep.subr.bf16.mxu0 %v914_v0  ;;  %705 = vmatprep.subr.bf16.mxu1 %v914_v0 }
  0x7b   :  { %662 = vmatmul.mubr.bf16.vlgmr.msra.gmra.mrb[0].mxu0 %v100_v15 }
  0x7c   :  { %701 = vmatprep.mubr.msk.bf16.mxu0 %vm915_vm0, %v914_v0  ;;  %686 = vmatpush3.bf16.msra.mxu0 %v751_v18 }
  0x7d   :  { %687 = vmatprep.subr.bf16.mxu0 %v914_v0 }
  0x80   :  { %688 = vmatpush3.bf16.msra.mxu0 %v752_v19 }
  0x81   :  { %689 = vmatprep.subr.bf16.mxu0 %v914_v0 }
  0x84   :  { %690 = vmatpush3.bf16.msra.mxu0 %v753_v20 }
  0x85   :  { %691 = vmatprep.subr.bf16.mxu0 %v914_v0 }
  0x88   :  { %692 = vmatpush3.bf16.msra.mxu0 %v754_v21 }
  0x89   :  { %693 = vmatprep.subr.bf16.mxu0 %v914_v0 }
  0x8c   :  { %694 = vmatpush3.bf16.msra.mxu0 %v755_v22 }
  0x8d   :  { %695 = vmatprep.subr.bf16.mxu0 %v914_v0 }
  0x90   :  { %696 = vmatpush3.bf16.msra.mxu0 %v756_v23 }
  0x91   :  { %697 = vmatprep.subr.bf16.mxu0 %v914_v0 }
  0x94   :  { %698 = vmatpush3.bf16.msra.mxu0 %v757_v32 }
  0x95   :  { %699 = vmatprep.subr.bf16.mxu0 %v914_v0 }
  0x98   :  { %700 = vmatpush3.bf16.msra.mxu0 %v758_v33 }
 0x14e   :  { %v206_v25 = vpop.f32.mrb[0].mxu0 }
 0x14f   :  { %v207_v26 = vadd.f32 %v573_v24, %v206_v25  ;;  %v663_v27 = vpop.f32.mrb[1].mxu0 }
 0x150   :  { %v209_v28 = vpop.f32.mrb[2].mxu0 }
 0x151   :  { %v212_v29 = vmax.f32 %v207_v26, 0.0  ;;  %v664_v30 = vpop.f32.mrb[3].mxu0 }
 0x153   :  { %v213_v31 = vpack.c.bf16 %v212_v29, %v212_v29 }
 0x155   :  { %682 = vmatmul.mubr.bf16.vlgmr.msra.gmra.mrb[0].mxu1 %v213_v31 }
 0x156   :  { %721 = vmatprep.mubr.msk.bf16.mxu1 %vm915_vm0, %v914_v0  ;;  %706 = vmatpush3.bf16.msra.mxu1 %v759_v34 }
 0x157   :  { %707 = vmatprep.subr.bf16.mxu1 %v914_v0 }
 0x15a   :  { %708 = vmatpush3.bf16.msra.mxu1 %v760_v35 }
 0x15b   :  { %709 = vmatprep.subr.bf16.mxu1 %v914_v0 }
 0x15e   :  { %710 = vmatpush3.bf16.msra.mxu1 %v761_v36 }
 0x15f   :  { %711 = vmatprep.subr.bf16.mxu1 %v914_v0 }
 0x162   :  { %712 = vmatpush3.bf16.msra.mxu1 %v762_v37 }
 0x163   :  { %713 = vmatprep.subr.bf16.mxu1 %v914_v0 }
 0x166   :  { %714 = vmatpush3.bf16.msra.mxu1 %v763_v46 }
 0x167   :  { %715 = vmatprep.subr.bf16.mxu1 %v914_v0 }
 0x16a   :  { %716 = vmatpush3.bf16.msra.mxu1 %v764_v47 }
 0x16b   :  { %717 = vmatprep.subr.bf16.mxu1 %v914_v0 }
 0x16e   :  { %718 = vmatpush3.bf16.msra.mxu1 %v765_v48 }
 0x16f   :  { %719 = vmatprep.subr.bf16.mxu1 %v914_v0 }
 0x172   :  { %720 = vmatpush3.bf16.msra.mxu1 %v766_v49 }
 0x228   :  { %v319_v39 = vpop.f32.mrb[0].mxu1 }
 0x229   :  { %v320_v40 = vadd.f32 %v582_v38, %v319_v39  ;;  %v683_v41 = vpop.f32.mrb[1].mxu1 }
 0x22a   :  { %v322_v42 = vpop.f32.mrb[2].mxu1 }
 0x22b   :  { %v325_v43 = vmax.f32 %v320_v40, 0.0  ;;  %v684_v44 = vpop.f32.mrb[3].mxu1 }
 0x22d   :  { %v326_v45 = vpack.c.bf16 %v325_v43, %v325_v43 }
 0x22f   :  { %702 = vmatmul.mubr.bf16.vlgmr.msra.gmra.mrb[4].mxu0 %v326_v45 }
 0x302   :  { %v432_v51 = vpop.f32.mrb[4].mxu0 }
 0x303   :  { %v433_v52 = vadd.f32 %v591_v50, %v432_v51  ;;  %v703_v53 = vpop.f32.mrb[5].mxu0 }
 0x304   :  { %v435_v54 = vpop.f32.mrb[6].mxu0 }
 0x305   :  { %v438_v55 = vadd.f32 3.0, %v433_v52  ;;  %v704_v56 = vpop.f32.mrb[7].mxu0 }
 0x307   :  { %v439_v57 = vmax.f32 %v438_v55, 0.0 }
 0x309   :  { %v440_v58 = vmin.f32 %v439_v57, 6.0 }
 0x30b   :  { %v441_v59 = vmul.f32 %v440_v58, %v433_v52 }
 0x30d   :  { %v442_v60 = vmul.f32 0.16666667, %v441_v59 }
 0x30f   :  { %v443_v61 = vpack.c.bf16 %v442_v60, %v442_v60 }
 0x311   :  { %722 = vmatmul.mubr.bf16.vlgmr.msra.gmra.mrb[4].mxu1 %v443_v61 }
 0x3e4   :  { %v549_v63 = vpop.f32.mrb[4].mxu1 }
 0x3e5   :  { %v550_v0 = vadd.f32 %v600_v62, %v549_v63  ;;  %v723_v1 = vpop.f32.mrb[5].mxu1 }
 0x3e6   :  { %v552_v2 = vpop.f32.mrb[6].mxu1 }
 0x3e7   :  { %555 = vst [vmem:[#allocation11] sm:$0xff] %v550_v0  ;;  %v724_v3 = vpop.f32.mrb[7].mxu1 }
 0x3e8   :  { %888 = shalt.err (!%p885_p2)
}
 0x3e9   :  { %s889_s8 = scalar_lea.hbm %s1112_s9, 128 }
 0x3ea   :  { %p890_p3 = scmp.ne.s32.totalorder %s1112_s9, %s889_s8  ;;  %p893_p4 = scmp.lt.u32.totalorder %s889_s8, %s1112_s9 }
 0x3ec   :  { %p895_p5 = pnand %p893_p4, %p890_p3 }
 0x3ee   :  { %898 = shalt.err (!%p895_p5)
}
 0x3ef   :  { %565 = dma.vmem_to_hbm [thread:$0]  %s563_s12, 128, %s1112_s9, [#allocation4]  }
 0x3f0   :  { %905 = dma.done.wait [#allocation4], 128  }
 0x3f1   :  { %906 = vsyncadd [#allocation4], 4294967168 }
 0x3f2   :  { %569 = vsyncpa [#allocation3], 1 }
 0x3f3   :  { %570 = vsyncpa [#allocation6], 1 }
 0x3f4   :  { %571 = vsyncpa [#allocation9], 1 }
 0x3f5   :  { %572 = vsyncpa [#allocation4], 1 }

</bundles_post_ra>
